<compile_context>
chip_gen: v7x
topology: tpu7x:2x2x1
jax: 0.10.0
libtpu: 0.0.40
codegen_flags: <defaults>
</compile_context>

<pallas_src>
import math

import jax
import jax.numpy as jnp
from jax.experimental import pallas as pl
from jax.experimental.pallas import tpu as pltpu


def gcn_kernel(alpha_ref, x_rows_ref, x_cols_ref, adj_ref, w_ref, rw_ref,
               b_ref, o_ref, ax_acc):
    """Grid step (b, i, k): row tile i of adj, column chunk k (reduction).

    ax = adj @ x is accumulated in f32 over k; at the last k the projections,
    bias, ReLU and alpha-blend are applied and the output tile is written.
    """
    k = pl.program_id(2)

    @pl.when(k == 0)
    def _init():
        ax_acc[...] = jnp.zeros_like(ax_acc)

    # Partial (adj @ x): (TN, TK) @ (TK, C_in) -> f32 accumulate.
    ax_acc[...] += jnp.dot(adj_ref[...], x_cols_ref[...],
                           preferred_element_type=jnp.float32)

    @pl.when(k == pl.num_programs(2) - 1)
    def _finalize():
        ax = ax_acc[...].astype(w_ref.dtype)          # back to bf16 for the MXU
        out = jnp.dot(ax, w_ref[...], preferred_element_type=jnp.float32)
        out = out + b_ref[...]                        # bias broadcast, f32
        residual = jnp.dot(x_rows_ref[...], rw_ref[...],
                           preferred_element_type=jnp.float32)
        alpha = jnp.clip(alpha_ref[0], 0.0, 1.0)      # scalar work on SMEM value
        o_ref[...] = (alpha * jnp.maximum(out, 0.0)
                      + (1.0 - alpha) * residual).astype(o_ref.dtype)


def _pick_tile(n, target, quantum):
    """Largest tile <= target that divides n and is a multiple of `quantum`;
    falls back to the full dimension (always a legal block shape)."""
    if n <= target:
        return n
    t = (target // quantum) * quantum
    while t >= quantum:
        if n % t == 0:
            return t
        t -= quantum
    return n


def graph_convolution(x, adj, weight, bias, res_weight, alpha,
                      *, compute_dtype=jnp.bfloat16,
                      row_tile=256, col_tile=512):
    """x: (B, N, C_in) f32. Returns (B, N, C_out) f32."""
    B, N, C_in = x.shape
    C_out = weight.shape[1]

    # Lane-dense output: pad channels to a multiple of 128 with zero
    # weight/bias columns (does not change the first C_out channels).
    C_pad = max(128, ((C_out + 127) // 128) * 128)
    pad = C_pad - C_out
    w_p = jnp.pad(weight, ((0, 0), (0, pad))).astype(compute_dtype)
    rw_p = jnp.pad(res_weight, ((0, 0), (0, pad))).astype(compute_dtype)
    b_p = jnp.pad(bias.reshape(1, C_out), ((0, 0), (0, pad))).astype(jnp.float32)

    x_c = x.astype(compute_dtype)
    adj_c = adj.astype(compute_dtype)
    alpha1d = jnp.asarray(alpha, jnp.float32).reshape(1)

    # Tile the node dimension on both adj axes so VMEM holds only
    # (tn, tk) of adj per step (plus double-buffering).
    tn = _pick_tile(N, row_tile, 8)      # output node rows per step
    tk = _pick_tile(N, col_tile, 128)    # reduction chunk (adj lane dim)
    grid = (B, N // tn, N // tk)

    out_padded = pl.pallas_call(
        gcn_kernel,
        out_shape=jax.ShapeDtypeStruct((B, N, C_pad), jnp.float32),
        grid_spec=pltpu.PrefetchScalarGridSpec(
            num_scalar_prefetch=0,
            grid=grid,
            in_specs=[
                pl.BlockSpec(memory_space=pltpu.SMEM),                      # alpha (1,)
                pl.BlockSpec((None, tn, C_in), lambda b, i, k: (b, i, 0)),  # x rows (residual)
                pl.BlockSpec((None, tk, C_in), lambda b, i, k: (b, k, 0)),  # x cols (adj @ x)
                pl.BlockSpec((tn, tk), lambda b, i, k: (i, k)),             # adj tile
                pl.BlockSpec((C_in, C_pad), lambda b, i, k: (0, 0)),        # W (padded)
                pl.BlockSpec((C_in, C_pad), lambda b, i, k: (0, 0)),        # W_res (padded)
                pl.BlockSpec((1, C_pad), lambda b, i, k: (0, 0)),           # bias (padded)
            ],
            out_specs=pl.BlockSpec((None, tn, C_pad), lambda b, i, k: (b, i, 0)),
            scratch_shapes=[pltpu.VMEM((tn, C_in), jnp.float32)],           # adj@x accumulator
        ),
        compiler_params=pltpu.CompilerParams(
            dimension_semantics=("parallel", "parallel", "arbitrary"),
            vmem_limit_bytes=32 * 1024 * 1024,
        ),
    )(alpha1d, x_c, x_c, adj_c, w_p, rw_p, b_p)

    return out_padded[:, :, :C_out]


def reference(x, adj, weight, bias, res_weight, alpha):
    support = jnp.einsum("bnc,cd->bnd", x, weight)
    out = jnp.einsum("nm,bmd->bnd", adj, support) + bias
    residual = jnp.einsum("bnc,cd->bnd", x, res_weight)
    a = jnp.clip(alpha, 0.0, 1.0)
    return a * jnp.maximum(out, 0.0) + (1.0 - a) * residual


if __name__ == "__main__":
    # Small, deterministic setup (synthetic parameters, no checkpoint / np.load).
    B, N, C_in, C_out = 2, 16, 32, 64

    key = jax.random.PRNGKey(0)
    k_x, k_w, k_b, k_rw, k_adj = jax.random.split(key, 5)

    # GCN weight / bias init: uniform(-stdv, stdv), stdv = 1/sqrt(out_features)
    stdv = 1.0 / math.sqrt(C_out)
    weight = jax.random.uniform(k_w, (C_in, C_out), jnp.float32, -stdv, stdv)
    bias = jax.random.uniform(k_b, (C_out,), jnp.float32, -stdv, stdv)

    # Residual linear (in_features != out_features), no bias. Stored as (C_in, C_out).
    bound = 1.0 / math.sqrt(C_in)
    res_weight = jax.random.uniform(k_rw, (C_in, C_out), jnp.float32, -bound, bound)

    # Synthetic row-normalized adjacency (stand-in for np.load(mat_path)).
    raw = jax.random.uniform(k_adj, (N, N), jnp.float32, 0.0, 1.0)
    adj = raw / jnp.sum(raw, axis=1, keepdims=True)

    alpha = jnp.asarray(0.5, jnp.float32)
    x = jax.random.normal(k_x, (B, N, C_in), jnp.float32)

    out = graph_convolution(x, adj, weight, bias, res_weight, alpha)
    out = jax.block_until_ready(out)

    ref = reference(x, adj, weight, bias, res_weight, alpha)
    assert out.shape == (B, N, C_out)
    # bf16 MXU inputs + (adj@x)@W reassociation => loosened tolerance vs f32 reference.
    assert jnp.allclose(out, ref, atol=2e-2, rtol=2e-2), float(jnp.max(jnp.abs(out - ref)))

    print("KERNEL_OK")
</pallas_src>

<mosaic_0001>
module attributes {stable_mosaic.version = 11 : i64} {
  func.func @gcn_kernel(%arg0: i32, %arg1: i32, %arg2: i32, %arg3: memref<1xf32, #tpu.memory_space<smem>>, %arg4: memref<1x16x32xbf16, #tpu.memory_space<vmem>>, %arg5: memref<1x16x32xbf16, #tpu.memory_space<vmem>>, %arg6: memref<16x16xbf16, #tpu.memory_space<vmem>>, %arg7: memref<32x128xbf16, #tpu.memory_space<vmem>>, %arg8: memref<32x128xbf16, #tpu.memory_space<vmem>>, %arg9: memref<1x128xf32, #tpu.memory_space<vmem>>, %arg10: memref<1x16x128xf32, #tpu.memory_space<vmem>>, %arg11: memref<16x32xf32, #tpu.memory_space<vmem>>) attributes {dimension_semantics = [#tpu.dimension_semantics<parallel>, #tpu.dimension_semantics<parallel>, #tpu.dimension_semantics<arbitrary>], iteration_bounds = array<i64: 2, 1, 1>, scalar_prefetch = 0 : i64, scratch_operands = 1 : i64, tpu.core_type = #tpu.core_type<tc>, window_params = [{transform_indices = @transform_0, window_bounds = array<i64: 1>}, {transform_indices = @transform_1, window_bounds = array<i64: 1, 16, 32>}, {transform_indices = @transform_2, window_bounds = array<i64: 1, 16, 32>}, {transform_indices = @transform_3, window_bounds = array<i64: 16, 16>}, {pipeline_mode = #tpu.pipeline_mode<synchronous>, transform_indices = @transform_4, window_bounds = array<i64: 32, 128>}, {pipeline_mode = #tpu.pipeline_mode<synchronous>, transform_indices = @transform_5, window_bounds = array<i64: 32, 128>}, {pipeline_mode = #tpu.pipeline_mode<synchronous>, transform_indices = @transform_6, window_bounds = array<i64: 1, 128>}, {transform_indices = @transform_7, window_bounds = array<i64: 1, 16, 128>}]} {
    %c0_i32 = arith.constant 0 : i32
    %0 = arith.cmpi eq, %arg2, %c0_i32 : i32
    %1 = arith.extui %0 : i1 to i32
    %c0_i32_0 = arith.constant 0 : i32
    %2 = arith.cmpi ne, %1, %c0_i32_0 : i32
    scf.if %2 {
      %cst_11 = arith.constant 0.000000e+00 : f32
      %13 = vector.broadcast %cst_11 : f32 to vector<16x32xf32>
      %c0_12 = arith.constant 0 : index
      %c0_13 = arith.constant 0 : index
      %14 = vector.load %arg11[%c0_12, %c0_13] : memref<16x32xf32, #tpu.memory_space<vmem>>, vector<16x32xf32>
      tpu.vector_store %arg11[%c0_12, %c0_13], %13 {strides = array<i32>} : memref<16x32xf32, #tpu.memory_space<vmem>>, vector<16x32xf32>,
    } else {
    }
    %c0 = arith.constant 0 : index
    %c0_1 = arith.constant 0 : index
    %3 = vector.load %arg11[%c0, %c0_1] : memref<16x32xf32, #tpu.memory_space<vmem>>, vector<16x32xf32>
    %c0_2 = arith.constant 0 : index
    %c0_3 = arith.constant 0 : index
    %4 = vector.load %arg6[%c0_2, %c0_3] : memref<16x16xbf16, #tpu.memory_space<vmem>>, vector<16x16xbf16>
    %c0_4 = arith.constant 0 : index
    %c0_5 = arith.constant 0 : index
    %c0_6 = arith.constant 0 : index
    %5 = vector.load %arg5[%c0_4, %c0_5, %c0_6] : memref<1x16x32xbf16, #tpu.memory_space<vmem>>, vector<1x16x32xbf16>
    %6 = vector.shape_cast %5 : vector<1x16x32xbf16> to vector<16x32xbf16>
    %cst = arith.constant dense<0.000000e+00> : vector<16x32xf32>
    %7 = tpu.matmul %4, %6, %cst {dimension_numbers = #tpu.dot_dimension_numbers<[1], [0], [0], [1], [0, 0, 1, 1], [], []>} : vector<16x16xbf16>, vector<16x32xbf16>, vector<16x32xf32> -> vector<16x32xf32>
    %8 = arith.addf %3, %7 : vector<16x32xf32>
    %c0_7 = arith.constant 0 : index
    %c0_8 = arith.constant 0 : index
    %9 = vector.load %arg11[%c0_7, %c0_8] : memref<16x32xf32, #tpu.memory_space<vmem>>, vector<16x32xf32>
    tpu.vector_store %arg11[%c0_7, %c0_8], %8 {strides = array<i32>} : memref<16x32xf32, #tpu.memory_space<vmem>>, vector<16x32xf32>,
    %c0_i32_9 = arith.constant 0 : i32
    %10 = arith.cmpi eq, %arg2, %c0_i32_9 : i32
    %11 = arith.extui %10 : i1 to i32
    %c0_i32_10 = arith.constant 0 : i32
    %12 = arith.cmpi ne, %11, %c0_i32_10 : i32
    scf.if %12 {
      %c0_11 = arith.constant 0 : index
      %c0_12 = arith.constant 0 : index
      %13 = vector.load %arg11[%c0_11, %c0_12] : memref<16x32xf32, #tpu.memory_space<vmem>>, vector<16x32xf32>
      %14 = arith.truncf %13 : vector<16x32xf32> to vector<16x32xbf16>
      %c0_13 = arith.constant 0 : index
      %c0_14 = arith.constant 0 : index
      %15 = vector.load %arg7[%c0_13, %c0_14] : memref<32x128xbf16, #tpu.memory_space<vmem>>, vector<32x128xbf16>
      %cst_15 = arith.constant dense<0.000000e+00> : vector<16x128xf32>
      %16 = tpu.matmul %14, %15, %cst_15 {dimension_numbers = #tpu.dot_dimension_numbers<[1], [0], [0], [1], [0, 0, 1, 1], [], []>} : vector<16x32xbf16>, vector<32x128xbf16>, vector<16x128xf32> -> vector<16x128xf32>
      %c0_16 = arith.constant 0 : index
      %c0_17 = arith.constant 0 : index
      %17 = vector.load %arg9[%c0_16, %c0_17] : memref<1x128xf32, #tpu.memory_space<vmem>>, vector<1x128xf32>
      %18 = vector.broadcast %17 : vector<1x128xf32> to vector<16x128xf32>
      %19 = arith.addf %16, %18 : vector<16x128xf32>
      %c0_18 = arith.constant 0 : index
      %c0_19 = arith.constant 0 : index
      %c0_20 = arith.constant 0 : index
      %20 = vector.load %arg4[%c0_18, %c0_19, %c0_20] : memref<1x16x32xbf16, #tpu.memory_space<vmem>>, vector<1x16x32xbf16>
      %21 = vector.shape_cast %20 : vector<1x16x32xbf16> to vector<16x32xbf16>
      %c0_21 = arith.constant 0 : index
      %c0_22 = arith.constant 0 : index
      %22 = vector.load %arg8[%c0_21, %c0_22] : memref<32x128xbf16, #tpu.memory_space<vmem>>, vector<32x128xbf16>
      %cst_23 = arith.constant dense<0.000000e+00> : vector<16x128xf32>
      %23 = tpu.matmul %21, %22, %cst_23 {dimension_numbers = #tpu.dot_dimension_numbers<[1], [0], [0], [1], [0, 0, 1, 1], [], []>} : vector<16x32xbf16>, vector<32x128xbf16>, vector<16x128xf32> -> vector<16x128xf32>
      %c0_24 = arith.constant 0 : index
      %24 = memref.load %arg3[%c0_24] : memref<1xf32, #tpu.memory_space<smem>>
      %cst_25 = arith.constant 0.000000e+00 : f32
      %cst_26 = arith.constant 1.000000e+00 : f32
      %25 = arith.maximumf %cst_25, %24 : f32
      %26 = arith.minimumf %cst_26, %25 : f32
      %cst_27 = arith.constant 0.000000e+00 : f32
      %27 = vector.broadcast %cst_27 : f32 to vector<16x128xf32>
      %28 = arith.maximumf %19, %27 : vector<16x128xf32>
      %29 = vector.broadcast %26 : f32 to vector<16x128xf32>
      %30 = arith.mulf %29, %28 : vector<16x128xf32>
      %cst_28 = arith.constant 1.000000e+00 : f32
      %31 = arith.subf %cst_28, %26 : f32
      %32 = vector.broadcast %31 : f32 to vector<16x128xf32>
      %33 = arith.mulf %32, %23 : vector<16x128xf32>
      %34 = arith.addf %30, %33 : vector<16x128xf32>
      %c0_29 = arith.constant 0 : index
      %c0_30 = arith.constant 0 : index
      %c0_31 = arith.constant 0 : index
      %35 = vector.load %arg10[%c0_29, %c0_30, %c0_31] : memref<1x16x128xf32, #tpu.memory_space<vmem>>, vector<1x16x128xf32>
      %36 = vector.shape_cast %35 : vector<1x16x128xf32> to vector<16x128xf32>
      %37 = vector.shape_cast %34 : vector<16x128xf32> to vector<1x16x128xf32>
      tpu.vector_store %arg10[%c0_29, %c0_30, %c0_31], %37 {strides = array<i32>} : memref<1x16x128xf32, #tpu.memory_space<vmem>>, vector<1x16x128xf32>,
    } else {
    }
    return
  }
  func.func @transform_0(%arg0: i32, %arg1: i32, %arg2: i32) -> i32 {
    %c0_i32 = arith.constant 0 : i32
    %c0_i32_0 = arith.constant 0 : i32
    return %c0_i32 : i32
  }
  func.func @transform_1(%arg0: i32, %arg1: i32, %arg2: i32) -> (i32, i32, i32) {
    %c0_i32 = arith.constant 0 : i32
    %c0_i32_0 = arith.constant 0 : i32
    return %arg0, %arg1, %c0_i32 : i32, i32, i32
  }
  func.func @transform_2(%arg0: i32, %arg1: i32, %arg2: i32) -> (i32, i32, i32) {
    %c0_i32 = arith.constant 0 : i32
    %c0_i32_0 = arith.constant 0 : i32
    return %arg0, %arg2, %c0_i32 : i32, i32, i32
  }
  func.func @transform_3(%arg0: i32, %arg1: i32, %arg2: i32) -> (i32, i32) {
    %c0_i32 = arith.constant 0 : i32
    return %arg1, %arg2 : i32, i32
  }
  func.func @transform_4(%arg0: i32, %arg1: i32, %arg2: i32) -> (i32, i32) {
    %c0_i32 = arith.constant 0 : i32
    %c0_i32_0 = arith.constant 0 : i32
    %c0_i32_1 = arith.constant 0 : i32
    return %c0_i32, %c0_i32_0 : i32, i32
  }
  func.func @transform_5(%arg0: i32, %arg1: i32, %arg2: i32) -> (i32, i32) {
    %c0_i32 = arith.constant 0 : i32
    %c0_i32_0 = arith.constant 0 : i32
    %c0_i32_1 = arith.constant 0 : i32
    return %c0_i32, %c0_i32_0 : i32, i32
  }
  func.func @transform_6(%arg0: i32, %arg1: i32, %arg2: i32) -> (i32, i32) {
    %c0_i32 = arith.constant 0 : i32
    %c0_i32_0 = arith.constant 0 : i32
    %c0_i32_1 = arith.constant 0 : i32
    return %c0_i32, %c0_i32_0 : i32, i32
  }
  func.func @transform_7(%arg0: i32, %arg1: i32, %arg2: i32) -> (i32, i32, i32) {
    %c0_i32 = arith.constant 0 : i32
    %c0_i32_0 = arith.constant 0 : i32
    return %arg0, %arg1, %c0_i32 : i32, i32, i32
  }
}

</mosaic_0001>

<bundles_post_ra>
// kernel: tpu_custom_call.1
= control target key start
LH: loop header
LB: loop body
LE: loop exit
PB: predicated region body
PF: predicated region fallthrough
CT: control target
= control target key end

     0   :  { %s1564_s0 = inlined_call_operand.<no memory space> [shape: f32[1], index: 0, kind: input, shape index: {}]   ;;  %s1565_s1 = inlined_call_operand.hbm [shape: bf16[2,16,32], index: 1, kind: input, shape index: {}]   ;;  %s1566_s2 = inlined_call_operand.hbm [shape: bf16[2,16,32], index: 2, kind: input, shape index: {}]   ;;  %s1567_s3 = inlined_call_operand.hbm [shape: bf16[16,16], index: 3, kind: input, shape index: {}]   ;;  %s1568_s4 = inlined_call_operand.hbm [shape: bf16[32,128], index: 4, kind: input, shape index: {}]   ;;  %s1569_s5 = inlined_call_operand.vmem [shape: bf16[32,128], index: 5, kind: input, shape index: {}]   ;;  %s1570_s6 = inlined_call_operand.vmem [shape: f32[1,128], index: 6, kind: input, shape index: {}]   ;;  %s1571_s7 = inlined_call_operand.hbm [shape: f32[2,16,128], index: 7, kind: output, shape index: {}]  }
   0x1   :  { %1582 = sst [smem:[#allocation22_spill]] %s1565_s1 }
   0x2   :  { %1583 = sst [smem:[#allocation23_spill]] %s1567_s3 }
   0x3   :  { %1584 = sst [smem:[#allocation24_spill]] %s1568_s4 }
   0x4   :  { %12 = sst [smem:[#allocation3]] %s1564_s0 }
   0x5   :  { %13 = vsyncpa [#allocation5], 0 }
   0x6   :  { %15 = vsyncpa [#allocation5 + $0x1], 0 }
   0x7   :  { %16 = vsyncpa [#allocation8], 0 }
   0x8   :  { %18 = vsyncpa [#allocation8 + $0x1], 0 }
   0x9   :  { %19 = vsyncpa [#allocation11], 0 }
   0xa   :  { %20 = vsyncpa [#allocation6], 0 }
   0xb   :  { %22 = vsyncpa [#allocation6 + $0x1], 0  ;;  %s1235_s26 = smov 0   ;;  %s1237_s27 = smov 0  }
   0xc   :  { %s1239_s28 = smov 0   ;;  %s1241_s29 = smov 0  }
   0xd   :  { %s1243_s30 = smov 0   ;;  %s1245_s8 = smov 0  }
   0xe LB: > { %1585 = sst [smem:[#allocation18_spill]] %s1165_s28  ;;  %s1266_s0 = sadd.s32 4294967295, %s1177_s8   ;;  %s1177_s8 = sphi %s1245_s8, %s28_s8   ;;  %s1173_s30 = sphi %s1243_s30, %s1612_s30   ;;  %s1169_s29 = sphi %s1241_s29, %s1611_s29   ;;  %s1165_s28 = sphi %s1239_s28, %s1610_s28   ;;  %s1161_s27 = sphi %s1237_s27, %s1614_s27   ;;  %s1157_s26 = sphi %s1235_s26, %s1613_s26  }
   0xf   : > { %1586 = sst [smem:[#allocation19_spill]] %s1173_s30  ;;  %s798_s9 = sadd.s32 4294967294, %s1177_s8  }
  0x10   : > { %p90_p0 = scmp.ne.s32.totalorder %s1161_s27, %s1157_s26  ;;  %p1572_p1 = scmp.eq.s32.totalorder %s1266_s0, 0 }
  0x11   : > { %p241_p3 = scmp.eq.s32.totalorder %s798_s9, 1  ;;  %p799_p5 = scmp.ge.s32.totalorder %s1177_s8, 1 }
  0x12   : > { %p1275_p4 = por %p1572_p1, %p90_p0  ;;  %p248_p7 = scmp.lt.s32.totalorder %s1177_s8, 3 }
  0x13   : > { %p1280_p6 = por %p241_p3, %p90_p0  ;;  %s1179_s13 = smov [#allocation9]  }
  0x14   : > { %s1587_s10 = scalar_select %p1275_p4, 1, 0 }
  0x15   : > { %s1588_s11 = scalar_select %p1280_p6, 1, 0 }
  0x16   : > { %p1285_p8 = pnand %p799_p5, %p248_p7  ;;  %s267_s14 = sshll.u32 %s1179_s13, 4  ;;  %s1289_s14 = int_to_ptr.vmem [resolvable:$true] %s267_s14 }
  0x17   : > { %s1180_s16 = smov [#allocation10]   ;;  %s1591_s3 = sld [smem:[#allocation23_spill]] }
  0x18   : > { %p878_p9 = pneg %p1285_p8  ;;  %s280_s17 = sshll.u32 %s1180_s16, 4  ;;  %s1300_s17 = int_to_ptr.vmem [resolvable:$true] %s280_s17 }
  0x1a   : > { %p1296_p11 = pnand %p878_p9, %p1572_p1 }
  0x1c   : > { %p969_p13 = pneg %p1296_p11 }
  0x1d   : > { %s967_s20 = scalar_lea.hbm %s1591_s3, 128 }
  0x1e   : > { %p968_p12 = scmp.ne.s32.totalorder %s1591_s3, %s967_s20  ;;  %p974_p5 = scmp.lt.u32.totalorder %s967_s20, %s1591_s3 }
  0x20   : > { %p970_p0 = pnand %p969_p13, %p968_p12 }
  0x22   : > { %p971_p3 = pneg %p970_p0 }
  0x24   : > { %p976_p7 = pnand %p974_p5, %p971_p3 }
  0x26   : > { %979 = shalt.err (!%p976_p7)
}
  0x27   : > { %s980_s25 = scalar_lea.vmem %s1289_s14, 128  ;;  %p988_p2 = scmp.lt.s32.totalorder %s1289_s14, %s1289_s14 }
  0x28   : > { %p981_p9 = scmp.ne.s32.totalorder %s1289_s14, %s980_s25  ;;  %p989_p12 = scmp.lt.s32.totalorder %s980_s25, %s980_s25 }
  0x2a   : > { %p983_p10 = pnand %p981_p9, %p969_p13  ;;  %p990_p0 = por %p989_p12, %p988_p2 }
  0x2c   : > { %p984_p1 = pneg %p983_p10 }
  0x2e   : > { %p991_p6 = pnand %p990_p0, %p984_p1 }
  0x30   : > { %994 = shalt.err (!%p991_p6)
}
  0x31   : > { %s1573_s9 = smov 64   ;;  %s1575_s13 = smov 4  }
  0x32   : > { %881 = dma.hbm_to_vmem [thread:$0]  (!%p1296_p11), %s1591_s3, 128, %s1289_s14, [#allocation8], %s1573_s9, %s1573_s9, %s1575_s13  }
  0x33   : > { %s1592_s4 = sld [smem:[#allocation24_spill]] }
  0x39   : > { %s995_s21 = scalar_lea.hbm %s1592_s4, 256 }
  0x3a   : > { %p996_p1 = scmp.ne.s32.totalorder %s1592_s4, %s995_s21  ;;  %p1002_p10 = scmp.lt.u32.totalorder %s995_s21, %s1592_s4 }
  0x3c   : > { %p998_p2 = pnand %p996_p1, %p969_p13 }
  0x3e   : > { %p999_p6 = pneg %p998_p2 }
  0x40   : > { %p1004_p3 = pnand %p1002_p10, %p999_p6 }
  0x42   : > { %1007 = shalt.err (!%p1004_p3)
}
  0x43   : > { %s1008_s14 = scalar_lea.vmem %s1300_s17, 256  ;;  %p1016_p12 = scmp.lt.s32.totalorder %s1300_s17, %s1300_s17 }
  0x44   : > { %p1009_p5 = scmp.ne.s32.totalorder %s1300_s17, %s1008_s14  ;;  %p1017_p0 = scmp.lt.s32.totalorder %s1008_s14, %s1008_s14 }
  0x46   : > { %p1011_p7 = pnand %p1009_p5, %p969_p13  ;;  %p1018_p1 = por %p1017_p0, %p1016_p12 }
  0x48   : > { %p1012_p9 = pneg %p1011_p7 }
  0x4a   : > { %p1019_p2 = pnand %p1018_p1, %p1012_p9 }
  0x4c   : > { %1022 = shalt.err (!%p1019_p2)
}
  0x4d   : > { %884 = dma.hbm_to_vmem [thread:$0]  (!%p1296_p11), %s1592_s4, 256, %s1300_s17, [#allocation11], %s1573_s9, %s1573_s9, %s1575_s13  }
  0x4e   : > { %s47_s15 = sadd.s32 1, %s1173_s30  ;;  %s77_s19 = sadd.s32 1, %s1165_s28 }
  0x4f   : > { %p49_p13 = scmp.ge.s32.totalorder %s47_s15, 2  ;;  %p84_p6 = scmp.ne.s32.totalorder %s1165_s28, %s1161_s27 }
  0x50   : > { %p85_p10 = scmp.eq.s32.totalorder %s1177_s8, 0  ;;  %p898_p3 = scmp.lt.s32.totalorder %s1177_s8, 2 }
  0x51   : > { %s1616_s15 = smov (%p49_p13, %s47_s15), 0  ;;  %p1594_p7 = scmp.eq.s32.totalorder %s1266_s0, 1 }
  0x52   : > { %1593 = sst [smem:[#allocation20_spill]] %s1616_s15  ;;  %p86_p5 = por %p85_p10, %p84_p6 }
  0x53   : > { %p1370_p9 = por %p1594_p7, %p84_p6  ;;  %s72_s21 = ssub.s32 %s1173_s30, %s1616_s15 }
  0x54   : > { %s300_s22 = sand.u32 1, %s1165_s28   ;;  %p75_p12 = scmp.eq.s32.totalorder %s72_s21, 0 }
  0x55   : > { %s1595_s20 = scalar_select %p1370_p9, 1, 0 }
  0x56   : > { %s1377_s17 = sshll.u32 %s300_s22, 3  ;;  %s831_s23 = sshll.u32 %s1173_s30, 7 }
  0x57   : > { %s1381_s24 = scalar_select %p75_p12, %s1165_s28, %s77_s19  }
  0x58   : > { %s1597_s1 = sld [smem:[#allocation22_spill]]  ;;  %s304_s18 = scalar_lea.vmem [#allocation4], %s1377_s17 }
  0x59   : > { %1596 = sst [smem:[#allocation21_spill]] %s1381_s24  ;;  %s313_s9 = sshll.u32 %s304_s18, 4  ;;  %s1395_s9 = int_to_ptr.vmem [resolvable:$true] %s313_s9 }
  0x5a   : > { %p1391_p11 = pnand %p898_p3, %p86_p5  ;;  %s1400_s25 = scalar_lea.hbm %s1566_s2, %s831_s23 }
  0x5b   : > { %s1402_s14 = scalar_lea.sflag [#allocation5], %s300_s22 }
  0x5c   : > { %p1025_p1 = pneg %p1391_p11 }
  0x5e   : > { %s1386_s16 = scalar_lea.hbm %s1597_s1, %s831_s23  ;;  %s1028_s15 = scalar_lea.hbm %s1597_s1, 256 }
  0x5f   : > { %s1023_s3 = scalar_lea.hbm %s1386_s16, 128  ;;  %p1029_p6 = scmp.lt.u32.totalorder %s1386_s16, %s1597_s1 }
  0x60   : > { %p1024_p0 = scmp.ne.s32.totalorder %s1386_s16, %s1023_s3  ;;  %p1030_p10 = scmp.lt.u32.totalorder %s1028_s15, %s1023_s3 }
  0x61   : > { %p1032_p5 = scmp.lt.u32.totalorder %s1023_s3, %s1386_s16 }
  0x62   : > { %p1026_p2 = pnand %p1025_p1, %p1024_p0  ;;  %p1031_p3 = por %p1030_p10, %p1029_p6 }
  0x64   : > { %p1027_p13 = pneg %p1026_p2  ;;  %p1033_p7 = por %p1032_p5, %p1031_p3 }
  0x66   : > { %p1034_p12 = pnand %p1033_p7, %p1027_p13 }
  0x68   : > { %1037 = shalt.err (!%p1034_p12)
}
  0x69   : > { %s1038_s13 = scalar_lea.vmem %s1395_s9, 128  ;;  %s1183_s4 = smov [#allocation4]  }
  0x6a   : > { %p1039_p0 = scmp.ne.s32.totalorder %s1395_s9, %s1038_s13  ;;  %s1043_s22 = sshll.u32 %s1183_s4, 4  ;;  %s1044_s22 = int_to_ptr.vmem [resolvable:$false] %s1043_s22 }
  0x6b   : > { %s1045_s30 = scalar_lea.vmem %s1044_s22, 256  ;;  %p1046_p4 = scmp.lt.s32.totalorder %s1395_s9, %s1044_s22 }
  0x6c   : > { %p1041_p2 = pnand %p1039_p0, %p1025_p1  ;;  %p1047_p6 = scmp.lt.s32.totalorder %s1045_s30, %s1038_s13 }
  0x6e   : > { %p1042_p9 = pneg %p1041_p2  ;;  %p1048_p10 = por %p1047_p6, %p1046_p4 }
  0x70   : > { %p1049_p3 = pnand %p1048_p10, %p1042_p9 }
  0x72   : > { %1052 = shalt.err (!%p1049_p3)
}
  0x73   : > { %s1599_s3 = smov 4   ;;  %s1600_s15 = smov 64  }
  0x74   : > { %888 = dma.hbm_to_vmem [thread:$0]  (!%p1391_p11), %s1386_s16, 128, %s1395_s9, %s1402_s14, %s1600_s15, %s1600_s15, %s1599_s3  }
  0x75   : > { %s327_s23 = scalar_lea.vmem [#allocation7], %s1377_s17  ;;  %s323_s19 = sand.u32 1, %s1177_s8  }
  0x76   : > { %s336_s24 = sshll.u32 %s327_s23, 4  ;;  %s1437_s18 = scalar_lea.sflag [#allocation8], %s323_s19  ;;  %s1435_s24 = int_to_ptr.vmem [resolvable:$true] %s336_s24 }
  0x77   : > { %s1053_s13 = scalar_lea.hbm %s1400_s25, 128  ;;  %s1058_s30 = scalar_lea.hbm %s1566_s2, 256 }
  0x78   : > { %p1054_p4 = scmp.ne.s32.totalorder %s1400_s25, %s1053_s13  ;;  %p1059_p5 = scmp.lt.u32.totalorder %s1400_s25, %s1566_s2 }
  0x79   : > { %p1060_p7 = scmp.lt.u32.totalorder %s1058_s30, %s1053_s13  ;;  %p1062_p0 = scmp.lt.u32.totalorder %s1053_s13, %s1400_s25 }
  0x7a   : > { %p1056_p9 = pnand %p1054_p4, %p1025_p1 }
  0x7b   : > { %p1061_p12 = por %p1060_p7, %p1059_p5 }
  0x7c   : > { %p1057_p13 = pneg %p1056_p9 }
  0x7d   : > { %p1063_p2 = por %p1062_p0, %p1061_p12 }
  0x7f   : > { %p1064_p6 = pnand %p1063_p2, %p1057_p13 }
  0x81   : > { %1067 = shalt.err (!%p1064_p6)
}
  0x82   : > { %s1068_s9 = scalar_lea.vmem %s1435_s24, 128  ;;  %s1184_s17 = smov [#allocation7]  }
  0x83   : > { %p1069_p10 = scmp.ne.s32.totalorder %s1435_s24, %s1068_s9  ;;  %s1073_s16 = sshll.u32 %s1184_s17, 4  ;;  %s1074_s16 = int_to_ptr.vmem [resolvable:$false] %s1073_s16 }
  0x84   : > { %s1075_s1 = scalar_lea.vmem %s1074_s16, 256  ;;  %p1076_p9 = scmp.lt.s32.totalorder %s1435_s24, %s1074_s16 }
  0x85   : > { %p1071_p3 = pnand %p1069_p10, %p1025_p1  ;;  %p1077_p5 = scmp.lt.s32.totalorder %s1075_s1, %s1068_s9 }
  0x87   : > { %p1072_p4 = pneg %p1071_p3  ;;  %p1078_p7 = por %p1077_p5, %p1076_p9 }
  0x89   : > { %p1079_p12 = pnand %p1078_p7, %p1072_p4 }
  0x8b   : > { %1082 = shalt.err (!%p1079_p12)
}
  0x8c   : > { %891 = dma.hbm_to_vmem [thread:$0]  (!%p1391_p11), %s1400_s25, 128, %s1435_s24, %s1437_s18, %s1600_s15, %s1600_s15, %s1599_s3  }
  0x8d   : > { %348 = sbr.rel (%p1285_p8) target bundleno = 627 (0x273), region = 48  ;;  %s1469_s28 = sand.u32 (!%p1285_p8), 1, %s1161_s27  }
  0x8e   : > { %s810_s14 = sshll.u32 (!%p1285_p8), %s1469_s28, 3  ;;  %s351_s23 = scalar_lea.sflag (!%p1285_p8), [#allocation5], %s1469_s28 }
  0x8f   : > { %s1473_s19 = scalar_lea.vmem (!%p1285_p8), [#allocation4], %s810_s14  ;;  %p1601_p1 = scmp.ne.s32.totalorder (!%p1285_p8), %s1587_s10, 0 }
  0x94   : > { %1136 = dma.done.wait (%p1601_p1), %s351_s23, 128  }
  0x95   : > { %1138 = vsyncadd (%p1601_p1), %s351_s23, 4294967168  ;;  %s359_s21 = sand.u32 1, %s1266_s0   ;;  %s363_s25 = scalar_lea.vmem [#allocation7], %s810_s14 }
  0x96   : > { %s360_s12 = scalar_lea.sflag [#allocation8], %s359_s21 }
  0x97   : > { %1140 = dma.done.wait (%p1601_p1), %s360_s12, 128  }
  0x98   : > { %1142 = vsyncadd (%p1601_p1), %s360_s12, 4294967168  ;;  %p1602_p8 = scmp.eq.s32.totalorder %s1266_s0, 0 }
  0x9a   : > { %1144 = dma.done.wait (%p1602_p8), [#allocation8], 128   ;;  %p1603_p11 = pmov %p1602_p8 }
  0x9b   : > { %p1604_p13 = pmov %p1602_p8 }
  0x9c   : > { %1146 = vsyncadd (%p1603_p11), [#allocation8], 4294967168 }
  0x9d   : > { %1148 = dma.done.wait (%p1604_p13), [#allocation11], 256   ;;  %p1605_p0 = pmov %p1602_p8 }
  0x9e   : > { %vm416_vm0 = vcmask 261120   ;;  %v1185_v0 = vmov 0.0   ;;  %vm1186_vm1 = vmmov 0   ;;  %v960_v1 = vld [vmem:[%s363_s25] sm:$0xff]   ;;  %v961_v2 = vld [vmem:[#allocation9] sm:$0xff]   ;;  %vm436_vm2 = vcmask 130048  }
  0x9f   : > { %1150 = vsyncadd (%p1605_p0), [#allocation11], 4294967040  ;;  %842 = vmatprep.subr.bf16.mxu0 %v1185_v0  ;;  %844 = vmatprep.mubr.msk.bf16.mxu0 %vm1186_vm1, %v1185_v0  ;;  %417 = vst.msk [vmem:[#allocation2] sm:$0xff] %vm416_vm0, %v1185_v0  ;;  %v962_v3 = vld [vmem:[#allocation10] sm:$0xff]   ;;  %v963_v4 = vld [vmem:[%s1569_s5] sm:$0xff]   ;;  %s626_s24 = sld [smem:[#allocation3]] }
  0xa0   : > { %418 = vst.msk [vmem:[#allocation2 + $0x8] sm:$0xff] %vm416_vm0, %v1185_v0  ;;  %848 = vmatprep.subr.bf16.mxu1 %v1185_v0  ;;  %852 = vmatprep.mubr.msk.bf16.mxu1 %vm1186_vm1, %v1185_v0  ;;  %v964_v5 = vld [vmem:[#allocation10 + $0x8] sm:$0xff]   ;;  %v965_v6 = vld [vmem:[%s1569_s5 + $0x8] sm:$0xff]   ;;  %v966_v7 = vld [vmem:[%s1473_s19] sm:$0xff]   ;;  %s1187_s18 = smov 0.0   ;;  %s1188_s4 = smov 1.0  }
  0xa1   : > { %843 = vmatpush3.bf16.msra.mxu0 %v960_v1  ;;  %849 = vmatpush3.bf16.msra.mxu1 %v962_v3  ;;  %v818_v23 = vld [vmem:[%s1570_s6] ss:$0 sm:$0xff]  ;;  %s814_s16 = sshll.u32 %s1469_s28, 4  ;;  %s833_s23 = sshll.u32 %s1169_s29, 8 }
  0xa2   : > { %856 = vmatprep.subr.bf16.mxu0 %v1185_v0  ;;  %850 = vmatprep.subr.bf16.mxu1 %v1185_v0  ;;  %s406_s1 = scalar_lea.vmem [#allocation12], %s814_s16  ;;  %s1515_s12 = scalar_lea.hbm %s1571_s7, %s833_s23 }
  0xa3   : > { %s658_s14 = sshll.u32 %s406_s1, 4  ;;  %s643_s25 = scalar_lea.sflag [#allocation6], %s1469_s28  ;;  %s1510_s14 = int_to_ptr.vmem [resolvable:$true] %s658_s14 }
  0xa4   : > { %845 = vmatmul.mubr.msk.bf16.vlgmr.msra.gmra.mrb[0].mxu0 %vm436_vm2, %v961_v2  ;;  %s1083_s0 = scalar_lea.vmem %s1510_s14, 256  ;;  %p1606_p6 = scmp.ne.s32.totalorder %s1595_s20, 0 }
  0xa5   : > { %860 = vmatprep.mubr.msk.bf16.mxu0 %vm1186_vm1, %v1185_v0  ;;  %857 = vmatpush3.bf16.msra.mxu0 %v963_v4  ;;  %s627_s13 = smax.f32 %s1187_s18, %s626_s24  ;;  %p1084_p2 = scmp.ne.s32.totalorder %s1510_s14, %s1083_s0 }
  0xa6   : > { %858 = vmatprep.subr.bf16.mxu0 %v1185_v0  ;;  %851 = vmatpush3.bf16.msra.mxu1 %v964_v5  ;;  %v419_v8 = vld [vmem:[#allocation2] sm:$0xff]  ;;  %s628_s22 = smin.f32 %s1188_s4, %s627_s13  ;;  %s1189_s29 = smov [#allocation12]  }
  0xa7   : > { %v420_v10 = vld [vmem:[#allocation2 + $0x8] sm:$0xff]  ;;  %s634_s30 = ssub.f32 1.0, %s628_s22  ;;  %v631_v28 = vstv %s628_s22  ;;  %p1085_p10 = pnand %p1084_p2, %p1606_p6 }
  0xa8   : > { %s1087_s10 = sshll.u32 %s1189_s29, 4  ;;  %s1088_s10 = int_to_ptr.vmem [resolvable:$false] %s1087_s10 }
  0xa9   : > { %859 = vmatpush3.bf16.msra.mxu0 %v965_v6  ;;  %v635_v25 = vstv %s634_s30  ;;  %p1086_p3 = pneg %p1085_p10  ;;  %s1089_s3 = scalar_lea.vmem %s1088_s10, 512 }
  0xaa   : > { %p1090_p4 = scmp.lt.s32.totalorder %s1510_s14, %s1088_s10  ;;  %p1091_p9 = scmp.lt.s32.totalorder %s1089_s3, %s1083_s0 }
  0xac   : > { %861 = vmatmul.mubr.msk.bf16.vlgmr.msra.gmra.mrb[4].mxu0 %vm416_vm0, %v966_v7  ;;  %p1092_p5 = por %p1091_p9, %p1090_p4 }
  0xae   : > { %p1093_p7 = pnand %p1092_p5, %p1086_p3 }
 0x177   : > { %v474_v9 = vpop.f32.mrb[0].mxu0 }
 0x178   : > { %v481_v11 = vadd.f32 %v474_v9, %v419_v8  ;;  %v846_v12 = vpop.f32.mrb[1].mxu0 }
 0x179   : > { %v477_v13 = vpop.f32.mrb[2].mxu0 }
 0x17a   : > { %484 = vst.msk [vmem:[#allocation2] sm:$0xff] %vm416_vm0, %v481_v11  ;;  %v482_v14 = vadd.f32 %v477_v13, %v420_v10  ;;  %v847_v15 = vpop.f32.mrb[3].mxu0 }
 0x17c   : > { %485 = vst.msk [vmem:[#allocation2 + $0x8] sm:$0xff] %vm416_vm0, %v482_v14 }
 0x17f   : > { %v619_v19 = vpop.f32.mrb[4].mxu0 }
 0x180   : > { %v862_v20 = vpop.f32.mrb[5].mxu0  ;;  %v636_v31 = vmul.f32 %v635_v25, %v619_v19 }
 0x181   : > { %v489_v16 = vld [vmem:[#allocation2] sm:$0xff]  ;;  %v622_v21 = vpop.f32.mrb[6].mxu0 }
 0x182   : > { %v863_v22 = vpop.f32.mrb[7].mxu0  ;;  %v637_v38 = vmul.f32 %v635_v25, %v622_v21 }
 0x183   : > { %v490_v17 = vld [vmem:[#allocation2 + $0x8] sm:$0xff] }
 0x184   : > { %v491_v18 = vpack.c.bf16 %v490_v17, %v489_v16 }
 0x186   : > { %853 = vmatmul.mubr.msk.bf16.vlgmr.msra.gmra.mrb[0].mxu1 %vm416_vm0, %v491_v18 }
 0x259   : > { %v552_v24 = vpop.f32.mrb[0].mxu1 }
 0x25a   : > { %v553_v26 = vadd.f32 %v818_v23, %v552_v24  ;;  %v854_v27 = vpop.f32.mrb[1].mxu1 }
 0x25b   : > { %v555_v29 = vpop.f32.mrb[2].mxu1 }
 0x25c   : > { %v629_v30 = vmax.f32 %v553_v26, 0.0  ;;  %v556_v32 = vadd.f32 %v818_v23, %v555_v29  ;;  %v855_v33 = vpop.f32.mrb[3].mxu1 }
 0x25e   : > { %v632_v34 = vmul.f32 %v631_v28, %v629_v30  ;;  %v630_v35 = vmax.f32 %v556_v32, 0.0 }
 0x260   : > { %v638_v36 = vadd.f32 %v636_v31, %v632_v34  ;;  %v633_v37 = vmul.f32 %v631_v28, %v630_v35 }
 0x262   : > { %640 = vst [vmem:[%s406_s1] sm:$0xff] %v638_v36  ;;  %v639_v39 = vadd.f32 %v637_v38, %v633_v37 }
 0x264   : > { %641 = vst [vmem:[%s406_s1 + $0x8] sm:$0xff] %v639_v39 }
 0x265   : > { %1096 = shalt.err (!%p1093_p7)
}
 0x266   : > { %s1097_s15 = scalar_lea.hbm %s1515_s12, 256  ;;  %s1101_s13 = scalar_lea.hbm %s1571_s7, 512 }
 0x267   : > { %p1098_p12 = scmp.ne.s32.totalorder %s1515_s12, %s1097_s15  ;;  %p1102_p11 = scmp.lt.u32.totalorder %s1515_s12, %s1571_s7 }
 0x268   : > { %p1103_p13 = scmp.lt.u32.totalorder %s1101_s13, %s1097_s15  ;;  %p1105_p2 = scmp.lt.u32.totalorder %s1097_s15, %s1515_s12 }
 0x269   : > { %p1099_p1 = pnand %p1098_p12, %p1606_p6 }
 0x26a   : > { %p1104_p0 = por %p1103_p13, %p1102_p11 }
 0x26b   : > { %p1100_p8 = pneg %p1099_p1 }
 0x26c   : > { %p1106_p10 = por %p1105_p2, %p1104_p0 }
 0x26e   : > { %p1107_p3 = pnand %p1106_p10, %p1100_p8 }
 0x270   : > { %1110 = shalt.err (!%p1107_p3)
}
 0x271   : > { %s1190_s30 = smov 128   ;;  %s1191_s9 = smov 8  }
 0x272   : > { %876 = dma.vmem_to_hbm [thread:$0]  (%p1606_p6), %s1510_s14, 256, %s1515_s12, %s643_s25, %s1190_s30, %s1190_s30, %s1191_s9  }
 0x273 PF: > { %s673_s17 = sand.u32 1, %s1157_s26   ;;  %p1607_p4 = scmp.ne.s32.totalorder %s1588_s11, 0 }
 0x274   : > { %p1608_p9 = scmp.ge.s32.totalorder %s1177_s8, 2  ;;  %s674_s16 = scalar_lea.sflag [#allocation6], %s673_s17 }
 0x276   : > { %p893_p5 = pnand %p1608_p9, %p1607_p4 }
 0x278   : > { %1152 = dma.done.wait (!%p893_p5), %s674_s16, 256  }
 0x279   : > { %1154 = vsyncadd (!%p893_p5), %s674_s16, 4294967040  ;;  %s28_s8 = sadd.s32 1, %s1177_s8   ;;  %s1609_s1 = sld [smem:[#allocation18_spill]] }
 0x27a   : > { %p25_p7 = scmp.ge.s32.totalorder %s28_s8, 4   ;;  %s1610_s28 = sld [smem:[#allocation21_spill]] }
 0x27b   : > { %s1611_s29 = sld [smem:[#allocation19_spill]]  ;;  %s1612_s30 = sld [smem:[#allocation20_spill]] }
 0x27c   : > { %s1613_s26 = smov %s1161_s27  ;;  %27 = sbr.rel (!%p25_p7) target bundleno = 14 (0xe), region = 123 }
 0x27f   : > { %s1614_s27 = smov %s1609_s1 }
 0x283   :  { %679 = vsyncpa [#allocation5], 1 }
 0x284   :  { %681 = vsyncpa [#allocation5 + $0x1], 1 }
 0x285   :  { %682 = vsyncpa [#allocation8], 1 }
 0x286   :  { %684 = vsyncpa [#allocation8 + $0x1], 1 }
 0x287   :  { %685 = vsyncpa [#allocation11], 1 }
 0x288   :  { %686 = vsyncpa [#allocation6], 1 }
 0x289   :  { %688 = vsyncpa [#allocation6 + $0x1], 1 }

</bundles_post_ra>
